<compile_context>
chip_gen: v7x
topology: tpu7x:2x2x1
jax: 0.10.0
libtpu: 0.0.40
codegen_flags: <defaults>
</compile_context>

<pallas_src>
import functools

import jax
import jax.numpy as jnp
from jax import lax
from jax.experimental import pallas as pl
from jax.experimental.pallas import tpu as pltpu

BN_EPS = 1e-5
LANE = 128


# ------------------------- kernels -------------------------

def _fc_bn_act_kernel(x_ref, wT_ref, gamma_ref, beta_ref, o_ref, *, apply_act):
    # y = x @ W^T  (Linear with bias=False, W already pre-transposed to (in, out) layout)
    y = jnp.dot(x_ref[...], wT_ref[...], preferred_element_type=jnp.float32)

    # BatchNorm1d (training mode): biased stats over the batch axis, folded into scale/shift.
    inv_b = 1.0 / y.shape[0]
    mean = jnp.sum(y, axis=0, keepdims=True) * inv_b
    meansq = jnp.sum(y * y, axis=0, keepdims=True) * inv_b
    var = jnp.maximum(meansq - mean * mean, 0.0)          # guard tiny negative from cancellation
    scale = gamma_ref[...] * lax.rsqrt(var + BN_EPS)       # rsqrt -> EUP slot
    shift = beta_ref[...] - mean * scale
    y = y * scale + shift                                  # single FMA-shaped epilogue pass

    if apply_act:
        y = jnp.maximum(y, 0.0)  # ReLU
    o_ref[...] = y.astype(o_ref.dtype)


def _fc_bias_act_kernel(x_ref, wT_ref, b_ref, o_ref, *, apply_act):
    # y = x @ W^T + b  (normalize=False path: Linear has a bias, no BN)
    y = jnp.dot(x_ref[...], wT_ref[...], preferred_element_type=jnp.float32)
    y = y + b_ref[...]
    if apply_act:
        y = jnp.maximum(y, 0.0)  # ReLU
    o_ref[...] = y.astype(o_ref.dtype)


# ------------------------- wrappers -------------------------

def _round_up(n, m):
    return ((n + m - 1) // m) * m


def _pad_last(a, to):
    pad = to - a.shape[-1]
    if pad == 0:
        return a
    return jnp.pad(a, [(0, 0)] * (a.ndim - 1) + [(0, pad)])


_VMEM_SPEC = pl.BlockSpec(memory_space=pltpu.MemorySpace.VMEM)


def fc_block_normalized(x, w, gamma, beta, *, activation=True):
    """FCBlock with normalize=True: Linear(bias=False) -> BatchNorm1d -> activation."""
    B, _ = x.shape
    out_f = w.shape[0]
    out_p = _round_up(out_f, LANE)

    # Pre-transpose + lane-pad the parameters once in the wrapper (constant layout work).
    wT = _pad_last(w.T, out_p)                       # (in_f, out_p), zero-padded columns
    gamma_p = _pad_last(gamma.reshape(1, out_f), out_p)
    beta_p = _pad_last(beta.reshape(1, out_f), out_p)

    kernel = functools.partial(_fc_bn_act_kernel, apply_act=activation)
    y = pl.pallas_call(
        kernel,
        out_shape=jax.ShapeDtypeStruct((B, out_p), x.dtype),
        in_specs=[_VMEM_SPEC, _VMEM_SPEC, _VMEM_SPEC, _VMEM_SPEC],
        out_specs=_VMEM_SPEC,
    )(x, wT, gamma_p, beta_p)
    return y[:, :out_f]


def fc_block_plain(x, w, b, *, activation=True):
    """FCBlock with normalize=False: Linear(bias=True) -> activation."""
    B, _ = x.shape
    out_f = w.shape[0]
    out_p = _round_up(out_f, LANE)

    wT = _pad_last(w.T, out_p)                       # (in_f, out_p)
    b_p = _pad_last(b.reshape(1, out_f), out_p)

    kernel = functools.partial(_fc_bias_act_kernel, apply_act=activation)
    y = pl.pallas_call(
        kernel,
        out_shape=jax.ShapeDtypeStruct((B, out_p), x.dtype),
        in_specs=[_VMEM_SPEC, _VMEM_SPEC, _VMEM_SPEC],
        out_specs=_VMEM_SPEC,
    )(x, wT, b_p)
    return y[:, :out_f]


# ------------------------- reference (pure JAX) -------------------------

def _ref_normalized(x, w, gamma, beta, activation=True):
    y = x @ w.T
    mean = jnp.mean(y, axis=0, keepdims=True)
    var = jnp.mean((y - mean) ** 2, axis=0, keepdims=True)
    y = (y - mean) / jnp.sqrt(var + BN_EPS) * gamma + beta
    return jnp.maximum(y, 0.0) if activation else y


def _ref_plain(x, w, b, activation=True):
    y = x @ w.T + b
    return jnp.maximum(y, 0.0) if activation else y


# ------------------------- main -------------------------

if __name__ == "__main__":
    key = jax.random.PRNGKey(0)
    k_x, k_w, k_b = jax.random.split(key, 3)

    B, in_f, out_f = 8, 32, 64

    x = jax.random.normal(k_x, (B, in_f), dtype=jnp.float32)

    # Deterministic parameter init (Kaiming-uniform-like bound, as nn.Linear would).
    bound = 1.0 / jnp.sqrt(jnp.float32(in_f))
    w = jax.random.uniform(k_w, (out_f, in_f), jnp.float32, -bound, bound)
    b = jax.random.uniform(k_b, (out_f,), jnp.float32, -bound, bound)
    gamma = jnp.ones((out_f,), jnp.float32)   # BatchNorm1d weight init
    beta = jnp.zeros((out_f,), jnp.float32)   # BatchNorm1d bias init

    # normalize=True, activation=ReLU
    out_norm = fc_block_normalized(x, w, gamma, beta, activation=True)
    jax.block_until_ready(out_norm)
    ref_norm = _ref_normalized(x, w, gamma, beta, activation=True)
    assert out_norm.shape == (B, out_f)
    assert jnp.allclose(out_norm, ref_norm, atol=1e-4, rtol=1e-4), "normalized path mismatch"

    # normalize=True, no activation
    out_norm_na = fc_block_normalized(x, w, gamma, beta, activation=False)
    jax.block_until_ready(out_norm_na)
    ref_norm_na = _ref_normalized(x, w, gamma, beta, activation=False)
    assert jnp.allclose(out_norm_na, ref_norm_na, atol=1e-4, rtol=1e-4), "normalized (no act) mismatch"

    # normalize=False, activation=ReLU
    out_plain = fc_block_plain(x, w, b, activation=True)
    jax.block_until_ready(out_plain)
    ref_plain = _ref_plain(x, w, b, activation=True)
    assert out_plain.shape == (B, out_f)
    assert jnp.allclose(out_plain, ref_plain, atol=1e-4, rtol=1e-4), "plain path mismatch"

    print("KERNEL_OK")
</pallas_src>

<mosaic_0001>
module attributes {stable_mosaic.version = 11 : i64} {
  func.func @_fc_bn_act_kernel(%arg0: memref<8x32xf32, #tpu.memory_space<vmem>>, %arg1: memref<32x128xf32, #tpu.memory_space<vmem>>, %arg2: memref<1x128xf32, #tpu.memory_space<vmem>>, %arg3: memref<1x128xf32, #tpu.memory_space<vmem>>, %arg4: memref<8x128xf32, #tpu.memory_space<vmem>>) attributes {dimension_semantics = [], scalar_prefetch = 0 : i64, scratch_operands = 0 : i64, tpu.core_type = #tpu.core_type<tc>} {
    %c0 = arith.constant 0 : index
    %c0_0 = arith.constant 0 : index
    %0 = vector.load %arg0[%c0, %c0_0] : memref<8x32xf32, #tpu.memory_space<vmem>>, vector<8x32xf32>
    %c0_1 = arith.constant 0 : index
    %c0_2 = arith.constant 0 : index
    %1 = vector.load %arg1[%c0_1, %c0_2] : memref<32x128xf32, #tpu.memory_space<vmem>>, vector<32x128xf32>
    %cst = arith.constant dense<0.000000e+00> : vector<8x128xf32>
    %2 = tpu.matmul %0, %1, %cst {dimension_numbers = #tpu.dot_dimension_numbers<[1], [0], [0], [1], [0, 0, 1, 1], [], []>} : vector<8x32xf32>, vector<32x128xf32>, vector<8x128xf32> -> vector<8x128xf32>
    %cst_3 = arith.constant dense<0.000000e+00> : vector<128xf32>
    %3 = vector.multi_reduction <add>, %2, %cst_3 [0] : vector<8x128xf32> to vector<128xf32>
    %4 = vector.shape_cast %3 : vector<128xf32> to vector<1x128xf32>
    %cst_4 = arith.constant 1.250000e-01 : f32
    %5 = vector.broadcast %cst_4 : f32 to vector<1x128xf32>
    %6 = arith.mulf %4, %5 : vector<1x128xf32>
    %7 = arith.mulf %2, %2 : vector<8x128xf32>
    %cst_5 = arith.constant dense<0.000000e+00> : vector<128xf32>
    %8 = vector.multi_reduction <add>, %7, %cst_5 [0] : vector<8x128xf32> to vector<128xf32>
    %9 = vector.shape_cast %8 : vector<128xf32> to vector<1x128xf32>
    %cst_6 = arith.constant 1.250000e-01 : f32
    %10 = vector.broadcast %cst_6 : f32 to vector<1x128xf32>
    %11 = arith.mulf %9, %10 : vector<1x128xf32>
    %12 = arith.mulf %6, %6 : vector<1x128xf32>
    %13 = arith.subf %11, %12 : vector<1x128xf32>
    %cst_7 = arith.constant 0.000000e+00 : f32
    %14 = vector.broadcast %cst_7 : f32 to vector<1x128xf32>
    %15 = arith.maximumf %13, %14 : vector<1x128xf32>
    %c0_8 = arith.constant 0 : index
    %c0_9 = arith.constant 0 : index
    %16 = vector.load %arg2[%c0_8, %c0_9] : memref<1x128xf32, #tpu.memory_space<vmem>>, vector<1x128xf32>
    %cst_10 = arith.constant 9.99999974E-6 : f32
    %17 = vector.broadcast %cst_10 : f32 to vector<1x128xf32>
    %18 = arith.addf %15, %17 : vector<1x128xf32>
    %19 = math.rsqrt %18 : vector<1x128xf32>
    %20 = arith.mulf %16, %19 : vector<1x128xf32>
    %c0_11 = arith.constant 0 : index
    %c0_12 = arith.constant 0 : index
    %21 = vector.load %arg3[%c0_11, %c0_12] : memref<1x128xf32, #tpu.memory_space<vmem>>, vector<1x128xf32>
    %22 = arith.mulf %6, %20 : vector<1x128xf32>
    %23 = arith.subf %21, %22 : vector<1x128xf32>
    %24 = vector.broadcast %20 : vector<1x128xf32> to vector<8x128xf32>
    %25 = arith.mulf %2, %24 : vector<8x128xf32>
    %26 = vector.broadcast %23 : vector<1x128xf32> to vector<8x128xf32>
    %27 = arith.addf %25, %26 : vector<8x128xf32>
    %cst_13 = arith.constant 0.000000e+00 : f32
    %28 = vector.broadcast %cst_13 : f32 to vector<8x128xf32>
    %29 = arith.maximumf %27, %28 : vector<8x128xf32>
    %c0_14 = arith.constant 0 : index
    %c0_15 = arith.constant 0 : index
    %30 = vector.load %arg4[%c0_14, %c0_15] : memref<8x128xf32, #tpu.memory_space<vmem>>, vector<8x128xf32>
    tpu.vector_store %arg4[%c0_14, %c0_15], %29 {strides = array<i32>} : memref<8x128xf32, #tpu.memory_space<vmem>>, vector<8x128xf32>,
    return
  }
}

</mosaic_0001>

<bundles_post_ra>
// kernel: tpu_custom_call.1
= control target key start
LH: loop header
LB: loop body
LE: loop exit
PB: predicated region body
PF: predicated region fallthrough
CT: control target
= control target key end

     0   :  { %9 = vsyncpa [#allocation3], 0  ;;  %s367_s0 = inlined_call_operand.hbm [shape: f32[8,32], index: 0, kind: input, shape index: {}]   ;;  %s368_s1 = inlined_call_operand.hbm [shape: f32[32,128], index: 1, kind: input, shape index: {}]   ;;  %s369_s2 = inlined_call_operand.vmem [shape: f32[1,128], index: 2, kind: input, shape index: {}]   ;;  %s370_s3 = inlined_call_operand.vmem [shape: f32[1,128], index: 3, kind: input, shape index: {}]   ;;  %s371_s4 = inlined_call_operand.hbm [shape: f32[8,128], index: 4, kind: output, shape index: {}]  }
   0x1   :  { %10 = vsyncpa [#allocation6], 0 }
   0x2   :  { %11 = vsyncpa [#allocation4], 0  ;;  %s285_s15 = smov [#allocation2]   ;;  %s286_s17 = smov [#allocation5]  }
   0x3   :  { %s18_s16 = sshll.u32 %s285_s15, 4  ;;  %s27_s18 = sshll.u32 %s286_s17, 4  ;;  %s19_s16 = int_to_ptr.vmem [resolvable:$true] %s18_s16  ;;  %s318_s18 = int_to_ptr.vmem [resolvable:$true] %s27_s18 }
   0x4   :  { %s213_s21 = scalar_lea.hbm %s367_s0, 128 }
   0x5   :  { %p214_p0 = scmp.ne.s32.totalorder %s367_s0, %s213_s21  ;;  %p217_p1 = scmp.lt.u32.totalorder %s213_s21, %s367_s0 }
   0x7   :  { %p219_p2 = pnand %p217_p1, %p214_p0 }
   0x9   :  { %222 = shalt.err (!%p219_p2)
}
   0xa   :  { %s223_s26 = scalar_lea.vmem %s19_s16, 128  ;;  %p228_p4 = scmp.lt.s32.totalorder %s19_s16, %s19_s16 }
   0xb   :  { %p224_p3 = scmp.ne.s32.totalorder %s19_s16, %s223_s26  ;;  %p229_p5 = scmp.lt.s32.totalorder %s223_s26, %s223_s26 }
   0xd   :  { %p230_p6 = por %p229_p5, %p228_p4 }
   0xf   :  { %p231_p7 = pnand %p230_p6, %p224_p3 }
  0x11   :  { %234 = shalt.err (!%p231_p7)
}
  0x12   :  { %21 = dma.hbm_to_vmem [thread:$0]  %s367_s0, 128, %s19_s16, [#allocation3]  }
  0x13   :  { %s235_s5 = scalar_lea.hbm %s368_s1, 512 }
  0x14   :  { %p236_p8 = scmp.ne.s32.totalorder %s368_s1, %s235_s5  ;;  %p239_p9 = scmp.lt.u32.totalorder %s235_s5, %s368_s1 }
  0x16   :  { %p241_p10 = pnand %p239_p9, %p236_p8 }
  0x18   :  { %244 = shalt.err (!%p241_p10)
}
  0x19   :  { %s245_s10 = scalar_lea.vmem %s318_s18, 512  ;;  %p250_p12 = scmp.lt.s32.totalorder %s318_s18, %s318_s18 }
  0x1a   :  { %p246_p11 = scmp.ne.s32.totalorder %s318_s18, %s245_s10  ;;  %p251_p13 = scmp.lt.s32.totalorder %s245_s10, %s245_s10 }
  0x1c   :  { %p252_p0 = por %p251_p13, %p250_p12 }
  0x1e   :  { %p253_p1 = pnand %p252_p0, %p246_p11 }
  0x20   :  { %256 = shalt.err (!%p253_p1)
}
  0x21   :  { %s287_s0 = smov 128   ;;  %s288_s11 = smov 8  }
  0x22   :  { %33 = dma.hbm_to_vmem [thread:$0]  %s368_s1, 512, %s318_s18, [#allocation6], %s287_s0, %s287_s0, %s288_s11  }
  0x23   :  { %279 = dma.done.wait [#allocation3], 128  }
  0x24   :  { %280 = vsyncadd [#allocation3], 4294967168 }
  0x25   :  { %281 = dma.done.wait [#allocation6], 512  }
  0x26   :  { %282 = vsyncadd [#allocation6], 4294966784  ;;  %v289_v0 = vmov 0.0|0.0   ;;  %vm290_vm0 = vmmov 0   ;;  %v291_v1 = vmov 0.0   ;;  %v45_v2 = vld [vmem:[#allocation5] sm:$0xff]  ;;  %v149_v30 = vlaneseq }
  0x27   :  { %197 = vmatprep.subr.bf16.mxu0 %v289_v0  ;;  %194 = vmatprep.mubr.msk.f32.mxu0 %vm290_vm0, %v291_v1  ;;  %v46_v3 = vld [vmem:[#allocation5 + $0x8] sm:$0xff]  ;;  %v47_v4 = vld [vmem:[#allocation5 + $0x10] sm:$0xff]  ;;  %v48_v6 = vld [vmem:[#allocation5 + $0x18] sm:$0xff]  ;;  %vm49_vm1 = vcmask 261120   ;;  %s292_s17 = smov [#allocation7]  }
  0x28   :  { %v198_v5 = vpack.c.bf16 %v46_v3, %v45_v2  ;;  %v201_v7 = vpack.c.bf16 %v48_v6, %v47_v4  ;;  %v44_v8 = vld [vmem:[#allocation2] sm:$0xff]  ;;  %v150_v31 = vshrl.u32 %v149_v30, 7  ;;  %s170_s18 = sshll.u32 %s292_s17, 4  ;;  %s171_s18 = int_to_ptr.vmem [resolvable:$true] %s170_s18 }
  0x29   :  { %v141_v32 = vld [vmem:[%s369_s2] sm:$0x1]  ;;  %s257_s19 = scalar_lea.vmem %s171_s18, 128  ;;  %p262_p3 = scmp.lt.s32.totalorder %s171_s18, %s171_s18 }
  0x2a   :  { %199 = vmatpush3.bf16.msra.mxu0 %v198_v5  ;;  %v151_v33 = vsub.s32 0, %v150_v31  ;;  %v145_v36 = vld [vmem:[%s370_s3] sm:$0x1]  ;;  %p258_p2 = scmp.ne.s32.totalorder %s171_s18, %s257_s19  ;;  %p263_p4 = scmp.lt.s32.totalorder %s257_s19, %s257_s19 }
  0x2b   :  { %200 = vmatprep.subr.bf16.mxu0 %v289_v0 }
  0x2c   :  { %p264_p5 = por %p263_p4, %p262_p3 }
  0x2e   :  { %202 = vmatpush3.bf16.msra.mxu0 %v201_v7  ;;  %p265_p6 = pnand %p264_p5, %p258_p2 }
  0x31   :  { %195 = vmatmul.mubr.msk.f32.vlgmr.msra.gmra.mrb[0].mxu0 %vm49_vm1, %v44_v8 }
 0x104   :  { %v119_v9 = vpop.f32.mrb[0].mxu0 }
 0x105   :  { %v123_v10 = vrot.slane %v119_v9, 4  ;;  %v130_v11 = vmul.f32 %v119_v9, %v119_v9  ;;  %v196_v12 = vpop.f32.mrb[1].mxu0 }
 0x107   :  { %v124_v13 = vadd.f32 %v123_v10, %v119_v9  ;;  %v131_v14 = vrot.slane %v130_v11, 4 }
 0x109   :  { %v125_v15 = vrot.slane %v124_v13, 2  ;;  %v132_v16 = vadd.f32 %v131_v14, %v130_v11 }
 0x10b   :  { %v126_v17 = vadd.f32 %v125_v15, %v124_v13  ;;  %v133_v18 = vrot.slane %v132_v16, 2 }
 0x10d   :  { %v127_v19 = vrot.slane %v126_v17, 1  ;;  %v134_v20 = vadd.f32 %v133_v18, %v132_v16 }
 0x10f   :  { %v128_v21 = vadd.f32 %v127_v19, %v126_v17  ;;  %v135_v22 = vrot.slane %v134_v20, 1 }
 0x111   :  { %v129_v23 = vmul.f32 0.125, %v128_v21  ;;  %v136_v24 = vadd.f32 %v135_v22, %v134_v20 }
 0x113   :  { %v137_v25 = vmul.f32 0.125, %v136_v24  ;;  %v138_v26 = vmul.f32 %v129_v23, %v129_v23 }
 0x115   :  { %v139_v27 = vsub.f32 %v137_v25, %v138_v26 }
 0x117   :  { %v140_v28 = vmax.f32 %v139_v27, 0.0 }
 0x119   :  { %v142_v29 = vadd.f32 1e-05, %v140_v28 }
 0x11b   :  { %211 = vrsqrt.f32 %v142_v29 }
 0x125   :  { %v212_v34 = vpop.eup %211 }
 0x126   :  { %v144_v35 = vmul.f32 %v212_v34, %v141_v32 }
 0x128   :  { %v152_v37 = vrot.slane %v144_v35, %v151_v33  ;;  %v146_v38 = vmul.f32 %v144_v35, %v129_v23 }
 0x12a   :  { %v147_v39 = vsub.f32 %v145_v36, %v146_v38  ;;  %v154_v40 = vmul.f32 %v152_v37, %v119_v9 }
 0x12c   :  { %v159_v41 = vrot.slane %v147_v39, %v151_v33 }
 0x12e   :  { %v161_v42 = vadd.f32 %v159_v41, %v154_v40 }
 0x130   :  { %v162_v43 = vmax.f32 %v161_v42, 0.0 }
 0x132   :  { %163 = vst [vmem:[#allocation7] sm:$0xff] %v162_v43 }
 0x133   :  { %268 = shalt.err (!%p265_p6)
}
 0x134   :  { %s269_s20 = scalar_lea.hbm %s371_s4, 128 }
 0x135   :  { %p270_p7 = scmp.ne.s32.totalorder %s371_s4, %s269_s20  ;;  %p273_p8 = scmp.lt.u32.totalorder %s269_s20, %s371_s4 }
 0x137   :  { %p275_p9 = pnand %p273_p8, %p270_p7 }
 0x139   :  { %278 = shalt.err (!%p275_p9)
}
 0x13a   :  { %173 = dma.vmem_to_hbm [thread:$0]  %s171_s18, 128, %s371_s4, [#allocation4]  }
 0x13b   :  { %283 = dma.done.wait [#allocation4], 128  }
 0x13c   :  { %284 = vsyncadd [#allocation4], 4294967168 }
 0x13d   :  { %177 = vsyncpa [#allocation3], 1 }
 0x13e   :  { %178 = vsyncpa [#allocation6], 1 }
 0x13f   :  { %179 = vsyncpa [#allocation4], 1 }

</bundles_post_ra>
